<compile_context>
chip_gen: v5e
topology: v5e:2x2
jax: 0.10.0
libtpu: 0.0.40
codegen_flags: <defaults>
</compile_context>

<pallas_src>
import math
import functools

import jax
import jax.numpy as jnp
import numpy as np
from jax.experimental import pallas as pl
from jax.experimental.pallas import tpu as pltpu

_LN_EPS = 1e-5                       # torch nn.LayerNorm default
_VMEM_LIMIT_BYTES = 48 * 1024 * 1024  # <= v7x 64 MiB physical, above default scoped limits


def _cparams(*dim_semantics):
    return pltpu.CompilerParams(dimension_semantics=dim_semantics,
                                vmem_limit_bytes=_VMEM_LIMIT_BYTES)


# ---------------- in-kernel math helpers ----------------------------------------

def _layernorm(x, g, b):
    mu = jnp.mean(x, axis=-1, keepdims=True)
    var = jnp.mean(jnp.square(x - mu), axis=-1, keepdims=True)
    return (x - mu) * jax.lax.rsqrt(var + _LN_EPS) * g + b


def _gelu(x):
    # tanh-form GELU: tanh executes in the EUP slot; |err| vs exact erf-GELU < 4e-4.
    c = math.sqrt(2.0 / math.pi)
    return 0.5 * x * (1.0 + jnp.tanh(c * (x + 0.044715 * x * x * x)))


def _softmax(x):
    m = jnp.max(x, axis=-1, keepdims=True)
    e = jnp.exp(x - m)
    return e * pl.reciprocal(jnp.sum(e, axis=-1, keepdims=True), approx=True)


def _mm(a, b):
    # bf16 MXU matmul with f32 accumulation.
    return jnp.dot(a.astype(jnp.bfloat16), b.astype(jnp.bfloat16),
                   preferred_element_type=jnp.float32)


def _qkt(q, k):
    # [M,d] x [N,d] -> [M,N], bf16 operands, f32 accumulation.
    return jax.lax.dot_general(q.astype(jnp.bfloat16), k.astype(jnp.bfloat16),
                               (((1,), (1,)), ((), ())),
                               preferred_element_type=jnp.float32)


# ---------------- Pallas kernels --------------------------------------------------

def _fourier_input_proj_kernel(pc_ref, feats_ref, freqs_ref, w_ref, b_ref, o_ref):
    # FourierEmbedder (torch column order: per input coord, all freqs) fused with the
    # input linear projection.  pc tile: [1, tn, 3] -> o: [1, tn, W].
    x = pc_ref[0]                                    # [tn, 3]
    fr = freqs_ref[...]                              # [1, F]
    embed = jnp.concatenate(
        [x[:, i:i + 1] * fr for i in range(x.shape[-1])], axis=-1)   # [tn, 3F]
    data = jnp.concatenate(
        [x, jnp.sin(embed), jnp.cos(embed), feats_ref[0]], axis=-1)  # [tn, 3+6F+C]
    o_ref[0] = _mm(data, w_ref[...]) + b_ref[...]


def _cross_attn_flash_kernel(q_ref, d_ref,
                             ln1g_ref, ln1b_ref, ln2g_ref, ln2b_ref,
                             wq_ref, bq_ref, wkv_ref, bkv_ref, wo_ref, bo_ref,
                             ln3g_ref, ln3b_ref, w1_ref, b1_ref, w2_ref, b2_ref,
                             o_ref,
                             q_scr, acc_scr, m_scr, l_scr, *, heads):
    # grid = (B, N_tiles): flash-style online softmax over the KV/points axis.
    n = pl.program_id(1)
    W = q_ref.shape[-1]
    dh = W // heads
    scale = dh ** -0.25        # applied to both q and k (shap-e / michelangelo)

    @pl.when(n == 0)
    def _init():
        xq = q_ref[0]                                            # [M, W] latent queries
        xn = _layernorm(xq, ln1g_ref[...], ln1b_ref[...])
        q_scr[...] = (_mm(xn, wq_ref[...]) + bq_ref[...]) * scale  # hoisted Q projection
        acc_scr[...] = jnp.zeros(acc_scr.shape, jnp.float32)
        m_scr[...] = jnp.full(m_scr.shape, -jnp.inf, jnp.float32)
        l_scr[...] = jnp.zeros(l_scr.shape, jnp.float32)

    d = d_ref[0]                                                 # [tn, W] KV tile
    dn = _layernorm(d, ln2g_ref[...], ln2b_ref[...])
    kv = _mm(dn, wkv_ref[...]) + bkv_ref[...]                    # hoisted KV projection [tn, 2W]

    for h in range(heads):                                       # kv layout: [head][k|v]
        qh = q_scr[:, h * dh:(h + 1) * dh]                       # [M, dh] (pre-scaled)
        kb = 2 * h * dh
        kh = kv[:, kb:kb + dh] * scale                           # [tn, dh]
        vh = kv[:, kb + dh:kb + 2 * dh]                          # [tn, dh]
        s = _qkt(qh, kh)                                         # [M, tn] f32
        m_prev = m_scr[h]
        m_cur = jnp.maximum(m_prev, jnp.max(s, axis=-1, keepdims=True))
        alpha = jnp.exp(m_prev - m_cur)
        p = jnp.exp(s - m_cur)
        l_scr[h] = alpha * l_scr[h] + jnp.sum(p, axis=-1, keepdims=True)
        acc_scr[h] = alpha * acc_scr[h] + _mm(p, vh)
        m_scr[h] = m_cur

    @pl.when(n == pl.num_programs(1) - 1)
    def _finalize():
        outs = [acc_scr[h] * pl.reciprocal(l_scr[h], approx=True) for h in range(heads)]
        o_all = jnp.concatenate(outs, axis=-1)                   # [M, W]
        x = q_ref[0] + _mm(o_all, wo_ref[...]) + bo_ref[...]     # single output projection
        xn3 = _layernorm(x, ln3g_ref[...], ln3b_ref[...])
        hid = _gelu(_mm(xn3, w1_ref[...]) + b1_ref[...])
        x = x + _mm(hid, w2_ref[...]) + b2_ref[...]
        o_ref[0] = x


def _self_attn_block_kernel(x_ref,
                            ln1g_ref, ln1b_ref, wqkv_ref, bqkv_ref, wo_ref, bo_ref,
                            ln2g_ref, ln2b_ref, w1_ref, b1_ref, w2_ref, b2_ref,
                            o_ref, *, heads):
    x = x_ref[0]                                                 # [M, W]
    W = x.shape[-1]
    dh = W // heads
    scale = dh ** -0.25

    xn = _layernorm(x, ln1g_ref[...], ln1b_ref[...])
    qkv = _mm(xn, wqkv_ref[...]) + bqkv_ref[...]                 # hoisted QKV projection [M, 3W]

    outs = []
    for h in range(heads):                                       # qkv layout: [head][q|k|v]
        base = 3 * h * dh
        qh = qkv[:, base:base + dh] * scale
        kh = qkv[:, base + dh:base + 2 * dh] * scale
        vh = qkv[:, base + 2 * dh:base + 3 * dh]
        att = _softmax(_qkt(qh, kh))                             # [M, M] f32
        outs.append(_mm(att, vh))                                # [M, dh]
    o_all = jnp.concatenate(outs, axis=-1)                       # [M, W]
    x = x + _mm(o_all, wo_ref[...]) + bo_ref[...]                # single output projection

    xn2 = _layernorm(x, ln2g_ref[...], ln2b_ref[...])
    hid = _gelu(_mm(xn2, w1_ref[...]) + b1_ref[...])
    x = x + _mm(hid, w2_ref[...]) + b2_ref[...]
    o_ref[0] = x


# ---------------- pallas_call wrappers --------------------------------------------

def fourier_input_proj(pc, feats, freqs, w, b, tile_n):
    B, N, _ = pc.shape
    C = feats.shape[-1]
    Wd = w.shape[1]
    assert N % tile_n == 0
    return pl.pallas_call(
        _fourier_input_proj_kernel,
        out_shape=jax.ShapeDtypeStruct((B, N, Wd), jnp.float32),
        grid=(B, N // tile_n),
        in_specs=[pl.BlockSpec((1, tile_n, 3), lambda bi, ni: (bi, ni, 0)),
                  pl.BlockSpec((1, tile_n, C), lambda bi, ni: (bi, ni, 0)),
                  pl.BlockSpec(freqs.shape, lambda bi, ni: (0, 0)),
                  pl.BlockSpec(w.shape, lambda bi, ni: (0, 0)),
                  pl.BlockSpec(b.shape, lambda bi, ni: (0, 0))],
        out_specs=pl.BlockSpec((1, tile_n, Wd), lambda bi, ni: (bi, ni, 0)),
        compiler_params=_cparams("parallel", "parallel"),
    )(pc, feats, freqs, w, b)


def cross_attn_block(query, data, p, heads, kv_tile):
    B, N, Wd = data.shape
    M = query.shape[0]
    dh = Wd // heads
    assert N % kv_tile == 0
    q3 = query[None]                   # [1, M, W]; (0,0,0) block == repeat over batch
    plist = [p["ln1_g"], p["ln1_b"], p["ln2_g"], p["ln2_b"],
             p["wq"], p["bq"], p["wkv"], p["bkv"], p["wo"], p["bo"],
             p["ln3_g"], p["ln3_b"], p["w1"], p["b1"], p["w2"], p["b2"]]
    in_specs = [pl.BlockSpec((1, M, Wd), lambda bi, ni: (0, 0, 0)),
                pl.BlockSpec((1, kv_tile, Wd), lambda bi, ni: (bi, ni, 0))] + \
               [pl.BlockSpec(a.shape, lambda bi, ni: (0, 0)) for a in plist]
    return pl.pallas_call(
        functools.partial(_cross_attn_flash_kernel, heads=heads),
        out_shape=jax.ShapeDtypeStruct((B, M, Wd), jnp.float32),
        grid=(B, N // kv_tile),
        in_specs=in_specs,
        out_specs=pl.BlockSpec((1, M, Wd), lambda bi, ni: (bi, 0, 0)),
        scratch_shapes=[pltpu.VMEM((M, Wd), jnp.float32),        # projected+scaled q
                        pltpu.VMEM((heads, M, dh), jnp.float32),  # per-head acc
                        pltpu.VMEM((heads, M, 1), jnp.float32),   # running max
                        pltpu.VMEM((heads, M, 1), jnp.float32)],  # running sum
        compiler_params=_cparams("parallel", "arbitrary"),
    )(q3, data, *plist)


def self_attn_block(x, p, heads):
    B, M, Wd = x.shape
    plist = [p["ln1_g"], p["ln1_b"], p["wqkv"], p["bqkv"], p["wo"], p["bo"],
             p["ln2_g"], p["ln2_b"], p["w1"], p["b1"], p["w2"], p["b2"]]
    in_specs = [pl.BlockSpec((1, M, Wd), lambda bi: (bi, 0, 0))] + \
               [pl.BlockSpec(a.shape, lambda bi: (0, 0)) for a in plist]
    return pl.pallas_call(
        functools.partial(_self_attn_block_kernel, heads=heads),
        out_shape=jax.ShapeDtypeStruct((B, M, Wd), jnp.float32),
        grid=(B,),
        in_specs=in_specs,
        out_specs=pl.BlockSpec((1, M, Wd), lambda bi: (bi, 0, 0)),
        compiler_params=_cparams("parallel"),
    )(x, *plist)


# ---------------- module glue (params, forward) ------------------------------------

def _fourier_freqs(num_freqs=6, include_pi=True):
    freqs = 2.0 ** jnp.arange(num_freqs, dtype=jnp.float32)
    if include_pi:
        freqs = freqs * jnp.pi
    return freqs


def init_params(key, *, num_latents, width, heads, layers, in_dim):
    keys = iter(jax.random.split(key, 64))

    def lin(din, dout, scale=0.02):
        kw, kb = jax.random.split(next(keys))
        return (jax.random.normal(kw, (din, dout), jnp.float32) * scale,
                jax.random.normal(kb, (1, dout), jnp.float32) * scale)

    def ln():
        return jnp.ones((1, width), jnp.float32), jnp.zeros((1, width), jnp.float32)

    params = {"query": jax.random.normal(next(keys), (num_latents, width), jnp.float32) * 0.02}
    params["in_w"], params["in_b"] = lin(in_dim, width)

    ca = {}
    ca["ln1_g"], ca["ln1_b"] = ln()
    ca["ln2_g"], ca["ln2_b"] = ln()
    ca["wq"], ca["bq"] = lin(width, width)
    ca["wkv"], ca["bkv"] = lin(width, 2 * width)
    ca["wo"], ca["bo"] = lin(width, width)
    ca["ln3_g"], ca["ln3_b"] = ln()
    ca["w1"], ca["b1"] = lin(width, 4 * width)
    ca["w2"], ca["b2"] = lin(4 * width, width)
    params["cross"] = ca

    blocks = []
    for _ in range(layers):
        sa = {}
        sa["ln1_g"], sa["ln1_b"] = ln()
        sa["wqkv"], sa["bqkv"] = lin(width, 3 * width)
        sa["wo"], sa["bo"] = lin(width, width)
        sa["ln2_g"], sa["ln2_b"] = ln()
        sa["w1"], sa["b1"] = lin(width, 4 * width)
        sa["w2"], sa["b2"] = lin(4 * width, width)
        blocks.append(sa)
    params["self_blocks"] = blocks
    return params


def encoder_forward(params, pc, feats, *, heads, num_freqs=6, proj_tile=None, kv_tile=None):
    # _forward with use_downsample=False, use_multi_reso=False, ln_post=None.
    # TODO(synk): use_downsample=True needs torch_cluster.fps (farthest point sampling);
    # no clean Pallas equivalent, branch is off in this config.
    B, N, _ = pc.shape
    if proj_tile is None:
        proj_tile = N
    if kv_tile is None:
        kv_tile = N
    freqs = _fourier_freqs(num_freqs).reshape(1, num_freqs)
    data = fourier_input_proj(pc, feats, freqs, params["in_w"], params["in_b"], proj_tile)
    latents = cross_attn_block(params["query"], data, params["cross"], heads, kv_tile)
    for sa in params["self_blocks"]:
        latents = self_attn_block(latents, sa, heads)
    return latents


# ---------------- pure-JAX reference (torch semantics, f32, exact GELU) -------------

def fourier_embed(x, num_freqs=6, include_pi=True):
    freqs = _fourier_freqs(num_freqs, include_pi)
    embed = (x[..., None] * freqs).reshape(*x.shape[:-1], -1)
    return jnp.concatenate([x, jnp.sin(embed), jnp.cos(embed)], axis=-1)


def reference_forward(params, pc, feats, *, heads):
    data = fourier_embed(pc)
    data = jnp.concatenate([data, feats], axis=-1)
    data = data @ params["in_w"] + params["in_b"][0]
    B = pc.shape[0]
    x = jnp.broadcast_to(params["query"][None], (B,) + params["query"].shape)

    def ln(v, g, b):
        mu = v.mean(-1, keepdims=True)
        var = ((v - mu) ** 2).mean(-1, keepdims=True)
        return (v - mu) / jnp.sqrt(var + _LN_EPS) * g[0] + b[0]

    gelu = functools.partial(jax.nn.gelu, approximate=False)

    ca = params["cross"]
    q = ln(x, ca["ln1_g"], ca["ln1_b"]) @ ca["wq"] + ca["bq"][0]
    kv = ln(data, ca["ln2_g"], ca["ln2_b"]) @ ca["wkv"] + ca["bkv"][0]
    Bq, M, Wd = q.shape
    N = kv.shape[1]
    dh = Wd // heads
    qh = q.reshape(Bq, M, heads, dh)
    kvh = kv.reshape(Bq, N, heads, 2 * dh)
    kh, vh = kvh[..., :dh], kvh[..., dh:]
    scale = 1.0 / math.sqrt(math.sqrt(dh))
    w = jax.nn.softmax(jnp.einsum("bthc,bshc->bhts", qh * scale, kh * scale), axis=-1)
    o = jnp.einsum("bhts,bshc->bthc", w, vh).reshape(Bq, M, Wd)
    x = x + o @ ca["wo"] + ca["bo"][0]
    h = gelu(ln(x, ca["ln3_g"], ca["ln3_b"]) @ ca["w1"] + ca["b1"][0])
    x = x + h @ ca["w2"] + ca["b2"][0]

    for sa in params["self_blocks"]:
        xn = ln(x, sa["ln1_g"], sa["ln1_b"])
        qkv = xn @ sa["wqkv"] + sa["bqkv"][0]
        qkvh = qkv.reshape(Bq, M, heads, 3 * dh)
        qh, kh, vh = qkvh[..., :dh], qkvh[..., dh:2 * dh], qkvh[..., 2 * dh:]
        w = jax.nn.softmax(jnp.einsum("bthc,bshc->bhts", qh * scale, kh * scale), axis=-1)
        o = jnp.einsum("bhts,bshc->bthc", w, vh).reshape(Bq, M, Wd)
        x = x + o @ sa["wo"] + sa["bo"][0]
        h = gelu(ln(x, sa["ln2_g"], sa["ln2_b"]) @ sa["w1"] + sa["b1"][0])
        x = x + h @ sa["w2"] + sa["b2"][0]
    return x


# ---------------- main ---------------------------------------------------------------

if __name__ == "__main__":
    B, N, C = 2, 16, 4
    num_latents, width, heads, layers = 8, 32, 4, 2
    num_freqs = 6
    in_dim = 3 * (2 * num_freqs + 1) + C   # FourierEmbedder.out_dim + point_feats = 43

    key = jax.random.PRNGKey(0)
    kpc, kft, kp = jax.random.split(key, 3)
    pc = jax.random.uniform(kpc, (B, N, 3), jnp.float32, minval=-1.0, maxval=1.0)
    feats = jax.random.normal(kft, (B, N, C), jnp.float32)
    params = init_params(kp, num_latents=num_latents, width=width, heads=heads,
                         layers=layers, in_dim=in_dim)

    # small tiles so the flash/online-softmax path (2 KV tiles) is actually exercised
    out = encoder_forward(params, pc, feats, heads=heads, num_freqs=num_freqs,
                          proj_tile=8, kv_tile=8)
    out = jax.block_until_ready(out)
    assert out.shape == (B, num_latents, width)

    ref = reference_forward(params, pc, feats, heads=heads)
    np.testing.assert_allclose(np.asarray(out), np.asarray(ref), atol=5e-3, rtol=5e-2)

    print("KERNEL_OK")
</pallas_src>

<mosaic_0001>
module attributes {stable_mosaic.version = 11 : i64} {
  func.func @_fourier_input_proj_kernel(%arg0: i32, %arg1: i32, %arg2: memref<1x8x3xf32, #tpu.memory_space<vmem>>, %arg3: memref<1x8x4xf32, #tpu.memory_space<vmem>>, %arg4: memref<1x6xf32, #tpu.memory_space<vmem>>, %arg5: memref<43x32xf32, #tpu.memory_space<vmem>>, %arg6: memref<1x32xf32, #tpu.memory_space<vmem>>, %arg7: memref<1x8x32xf32, #tpu.memory_space<vmem>>) attributes {dimension_semantics = [#tpu.dimension_semantics<parallel>, #tpu.dimension_semantics<parallel>], iteration_bounds = array<i64: 2, 2>, scalar_prefetch = 0 : i64, scratch_operands = 0 : i64, tpu.core_type = #tpu.core_type<tc>, window_params = [{transform_indices = @transform_0, window_bounds = array<i64: 1, 8, 3>}, {transform_indices = @transform_1, window_bounds = array<i64: 1, 8, 4>}, {pipeline_mode = #tpu.pipeline_mode<synchronous>, transform_indices = @transform_2, window_bounds = array<i64: 1, 6>}, {pipeline_mode = #tpu.pipeline_mode<synchronous>, transform_indices = @transform_3, window_bounds = array<i64: 43, 32>}, {pipeline_mode = #tpu.pipeline_mode<synchronous>, transform_indices = @transform_4, window_bounds = array<i64: 1, 32>}, {transform_indices = @transform_5, window_bounds = array<i64: 1, 8, 32>}]} {
    %c0 = arith.constant 0 : index
    %c0_0 = arith.constant 0 : index
    %c0_1 = arith.constant 0 : index
    %0 = vector.load %arg2[%c0, %c0_0, %c0_1] : memref<1x8x3xf32, #tpu.memory_space<vmem>>, vector<1x8x3xf32>
    %1 = vector.shape_cast %0 : vector<1x8x3xf32> to vector<8x3xf32>
    %c0_2 = arith.constant 0 : index
    %c0_3 = arith.constant 0 : index
    %2 = vector.load %arg4[%c0_2, %c0_3] : memref<1x6xf32, #tpu.memory_space<vmem>>, vector<1x6xf32>
    %3 = vector.extract_strided_slice %1 {offsets = [0, 0], sizes = [8, 1], strides = [1, 1]} : vector<8x3xf32> to vector<8x1xf32>
    %4 = vector.broadcast %3 : vector<8x1xf32> to vector<8x6xf32>
    %5 = vector.broadcast %2 : vector<1x6xf32> to vector<8x6xf32>
    %6 = arith.mulf %4, %5 : vector<8x6xf32>
    %7 = vector.extract_strided_slice %1 {offsets = [0, 1], sizes = [8, 1], strides = [1, 1]} : vector<8x3xf32> to vector<8x1xf32>
    %8 = vector.broadcast %7 : vector<8x1xf32> to vector<8x6xf32>
    %9 = vector.broadcast %2 : vector<1x6xf32> to vector<8x6xf32>
    %10 = arith.mulf %8, %9 : vector<8x6xf32>
    %11 = vector.extract_strided_slice %1 {offsets = [0, 2], sizes = [8, 1], strides = [1, 1]} : vector<8x3xf32> to vector<8x1xf32>
    %12 = vector.broadcast %11 : vector<8x1xf32> to vector<8x6xf32>
    %13 = vector.broadcast %2 : vector<1x6xf32> to vector<8x6xf32>
    %14 = arith.mulf %12, %13 : vector<8x6xf32>
    %15 = tpu.concatenate %6, %10, %14 in 1 : vector<8x6xf32>, vector<8x6xf32>, vector<8x6xf32> -> vector<8x18xf32>
    %16 = math.sin %15 : vector<8x18xf32>
    %17 = math.cos %15 : vector<8x18xf32>
    %c0_4 = arith.constant 0 : index
    %c0_5 = arith.constant 0 : index
    %c0_6 = arith.constant 0 : index
    %18 = vector.load %arg3[%c0_4, %c0_5, %c0_6] : memref<1x8x4xf32, #tpu.memory_space<vmem>>, vector<1x8x4xf32>
    %19 = vector.shape_cast %18 : vector<1x8x4xf32> to vector<8x4xf32>
    %20 = tpu.concatenate %1, %16, %17, %19 in 1 : vector<8x3xf32>, vector<8x18xf32>, vector<8x18xf32>, vector<8x4xf32> -> vector<8x43xf32>
    %c0_7 = arith.constant 0 : index
    %c0_8 = arith.constant 0 : index
    %21 = vector.load %arg5[%c0_7, %c0_8] : memref<43x32xf32, #tpu.memory_space<vmem>>, vector<43x32xf32>
    %22 = arith.truncf %20 : vector<8x43xf32> to vector<8x43xbf16>
    %23 = arith.truncf %21 : vector<43x32xf32> to vector<43x32xbf16>
    %cst = arith.constant dense<0.000000e+00> : vector<8x32xf32>
    %24 = tpu.matmul %22, %23, %cst {dimension_numbers = #tpu.dot_dimension_numbers<[1], [0], [0], [1], [0, 0, 1, 1], [], []>} : vector<8x43xbf16>, vector<43x32xbf16>, vector<8x32xf32> -> vector<8x32xf32>
    %c0_9 = arith.constant 0 : index
    %c0_10 = arith.constant 0 : index
    %25 = vector.load %arg6[%c0_9, %c0_10] : memref<1x32xf32, #tpu.memory_space<vmem>>, vector<1x32xf32>
    %26 = vector.broadcast %25 : vector<1x32xf32> to vector<8x32xf32>
    %27 = arith.addf %24, %26 : vector<8x32xf32>
    %c0_11 = arith.constant 0 : index
    %c0_12 = arith.constant 0 : index
    %c0_13 = arith.constant 0 : index
    %28 = vector.load %arg7[%c0_11, %c0_12, %c0_13] : memref<1x8x32xf32, #tpu.memory_space<vmem>>, vector<1x8x32xf32>
    %29 = vector.shape_cast %28 : vector<1x8x32xf32> to vector<8x32xf32>
    %30 = vector.shape_cast %27 : vector<8x32xf32> to vector<1x8x32xf32>
    tpu.vector_store %arg7[%c0_11, %c0_12, %c0_13], %30 {strides = array<i32>} : memref<1x8x32xf32, #tpu.memory_space<vmem>>, vector<1x8x32xf32>,
    return
  }
  func.func @transform_0(%arg0: i32, %arg1: i32) -> (i32, i32, i32) {
    %c0_i32 = arith.constant 0 : i32
    %c0_i32_0 = arith.constant 0 : i32
    return %arg0, %arg1, %c0_i32 : i32, i32, i32
  }
  func.func @transform_1(%arg0: i32, %arg1: i32) -> (i32, i32, i32) {
    %c0_i32 = arith.constant 0 : i32
    %c0_i32_0 = arith.constant 0 : i32
    return %arg0, %arg1, %c0_i32 : i32, i32, i32
  }
  func.func @transform_2(%arg0: i32, %arg1: i32) -> (i32, i32) {
    %c0_i32 = arith.constant 0 : i32
    %c0_i32_0 = arith.constant 0 : i32
    %c0_i32_1 = arith.constant 0 : i32
    return %c0_i32, %c0_i32_0 : i32, i32
  }
  func.func @transform_3(%arg0: i32, %arg1: i32) -> (i32, i32) {
    %c0_i32 = arith.constant 0 : i32
    %c0_i32_0 = arith.constant 0 : i32
    %c0_i32_1 = arith.constant 0 : i32
    return %c0_i32, %c0_i32_0 : i32, i32
  }
  func.func @transform_4(%arg0: i32, %arg1: i32) -> (i32, i32) {
    %c0_i32 = arith.constant 0 : i32
    %c0_i32_0 = arith.constant 0 : i32
    %c0_i32_1 = arith.constant 0 : i32
    return %c0_i32, %c0_i32_0 : i32, i32
  }
  func.func @transform_5(%arg0: i32, %arg1: i32) -> (i32, i32, i32) {
    %c0_i32 = arith.constant 0 : i32
    %c0_i32_0 = arith.constant 0 : i32
    return %arg0, %arg1, %c0_i32 : i32, i32, i32
  }
}

</mosaic_0001>

<bundles_post_ra>
// kernel: tpu_custom_call.1
= control target key start
LH: loop header
LB: loop body
LE: loop exit
PB: predicated region body
PF: predicated region fallthrough
CT: control target
= control target key end

     0   :  { %s1272_s0 = inlined_call_operand.vmem [shape: f32[2,16,3], index: 0, kind: input, shape index: {}]   ;;  %s1273_s1 = inlined_call_operand.vmem [shape: f32[2,16,4], index: 1, kind: input, shape index: {}]   ;;  %s1274_s2 = inlined_call_operand.vmem [shape: f32[1,6], index: 2, kind: input, shape index: {}]   ;;  %s1275_s3 = inlined_call_operand.vmem [shape: f32[43,32], index: 3, kind: input, shape index: {}]   ;;  %s1276_s4 = inlined_call_operand.vmem [shape: f32[1,32], index: 4, kind: input, shape index: {}]   ;;  %s1277_s5 = inlined_call_operand.hbm [shape: f32[2,16,32], index: 5, kind: output, shape index: {}]  }
   0x1   :  { %1278 = sst [smem:[#allocation5_spill]] %s1272_s0 }
   0x2   :  { %10 = vsyncpa [#allocation3], 0 }
   0x3   :  { %12 = vsyncpa [#allocation3 + $0x1], 0  ;;  %s1049_s18 = smov 0   ;;  %s1051_s19 = smov 0  }
   0x4   :  { %s1053_s20 = smov 0   ;;  %s1055_s21 = smov 0  }
   0x5   :  { %s1057_s22 = smov 0   ;;  %s1059_s23 = smov 0  }
   0x6   :  { %s1061_s24 = smov 0   ;;  %s1063_s25 = smov 0  }
   0x7 LB: > { %s795_s26 = sadd.s32 4294967295, %s1002_s25   ;;  %s796_s27 = sadd.s32 4294967294, %s1002_s25   ;;  %s1002_s25 = sphi %s1063_s25, %s18_s25   ;;  %s998_s24 = sphi %s1061_s24, %s1288_s24   ;;  %s994_s23 = sphi %s1059_s23, %s1287_s23   ;;  %s990_s22 = sphi %s1057_s22, %s1286_s22   ;;  %s986_s21 = sphi %s1055_s21, %s1285_s21   ;;  %s982_s20 = sphi %s1053_s20, %s1284_s20   ;;  %s978_s19 = sphi %s1051_s19, %s1283_s19   ;;  %s974_s18 = sphi %s1049_s18, %s1282_s18  }
   0x8   : > { %s27_s28 = sadd.s32 1, %s994_s23  ;;  %s30_s29 = sadd.s32 1, %s998_s24 }
   0x9   : > { %p28_p0 = scmp.ge.s32.totalorder %s27_s28, 2  ;;  %p168_p1 = scmp.ne.s32.totalorder %s982_s20, %s978_s19 }
   0xa   : > { %p169_p2 = scmp.eq.s32.totalorder %s795_s26, 3  ;;  %p174_p5 = scmp.ne.s32.totalorder %s978_s19, %s974_s18 }
   0xb   : > { %s1290_s28 = smov (%p28_p0, %s27_s28), 0  ;;  %s1292_s29 = smov (!%p28_p0, %s30_s29), %s998_s24 }
   0xc   : > { %s154_s30 = ssub.s32 %s994_s23, %s1290_s28  ;;  %p1100_p3 = por %p169_p2, %p168_p1 }
   0xd   : > { %p32_p4 = scmp.ge.s32.totalorder %s1292_s29, 2  ;;  %p175_p6 = scmp.eq.s32.totalorder %s796_s27, 3 }
   0xe   : > { %p799_p7 = scmp.ge.s32.totalorder %s1002_s25, 1  ;;  %p224_p9 = scmp.lt.s32.totalorder %s1002_s25, 5 }
   0xf   : > { %s1294_s29 = smov (%p32_p4, %s1292_s29), 0  ;;  %p1109_p8 = por %p175_p6, %p174_p5 }
  0x10   : > { %s153_s8 = ssub.s32 %s998_s24, %s1294_s29  ;;  %s158_s9 = sadd.s32 1, %s982_s20 }
  0x11   : > { %s155_s10 = sor.u32 %s154_s30, %s153_s8  ;;  %p225_p10 = pnand %p799_p7, %p224_p9 }
  0x12   : > { %p156_p11 = scmp.eq.s32.totalorder %s155_s10, 0  ;;  %p263_p12 = scmp.lt.s32.totalorder (!%p225_p10), %s990_s22, 1 }
  0x13   : > { %228 = sbr.rel (%p225_p10) target bundleno = 614 (0x266), region = 40  ;;  %p265_p13 = scmp.lt.s32.totalorder (!%p225_p10), %s986_s21, 1 }
  0x14   : > { %s1118_s11 = scalar_select %p156_p11, %s982_s20, %s158_s9  }
  0x15   : > { %s1281_s0 = sld [smem:[#allocation5_spill]] (!%p225_p10)  ;;  %s1007_s9 = smov (!%p225_p10), 6  }
  0x16   : > { %s1008_s10 = smov (!%p225_p10), 12   ;;  %s813_s30 = sshll.u32 (!%p225_p10), %s990_s22, 1 }
  0x17   : > { %s692_s8 = sadd.s32 (!%p225_p10), %s986_s21, %s813_s30 }
  0x18   : > { %v1004_v0 = vmov 1   ;;  %v1005_v1 = vmov 0   ;;  %s264_s12 = scalar_select %p263_p12, %s990_s22, 1  ;;  %v1006_v3 = vmov 2   ;;  %v906_v4 = vld [vmem:[%s1274_s2] ss:$0 sm:$0xff] }
  0x19   : > { %903 = vset.pattern.permute.xlu0 %v1004_v0  ;;  %905 = vset.pattern.permute.xlu1 %v1005_v1  ;;  %s266_s13 = scalar_select %p265_p13, %s986_s21, 1  ;;  %vm309_vm0 = vcmask 48128   ;;  %vm311_vm1 = vcmask 97280   ;;  %v1009_v26 = vmov 683565275  }
  0x1a   : > { %s801_s14 = sshll.u32 %s264_s12, 1  ;;  %v1010_v28 = vmov 2475754826   ;;  %v1011_v31 = vmov 2131351028   ;;  %s1015_s12 = smov 21  }
  0x1b   : > { %s1125_s15 = sadd.s32 %s801_s14, %s266_s13  ;;  %v1012_v34 = vmov 2102212464   ;;  %v1013_v37 = vmov 920167782   ;;  %v1014_v40 = vmov 1326507024  }
  0x1c   : > { %s802_s16 = sshll.u32 %s1125_s15, 3  ;;  %s1016_s13 = smov 3  }
  0x1d   : > { %s270_s27 = scalar_lea.vmem %s1281_s0, %s802_s16  ;;  %s278_s26 = scalar_lea.vmem %s1273_s1, %s802_s16 }
  0x1e   : > { %v1133_v2 = vld [vmem:[%s270_s27] sm:$0xff]  ;;  %s1017_s27 = smov 39  }
  0x1f   : > { %292 = vperm.xlu0 %903, %v1133_v2   ;;  %284 = vperm.xlu1 %905, %v1133_v2  }
  0x27   : > { %904 = vset.pattern.permute.xlu0 %v1006_v3 }
  0x28   : > { %297 = vperm.xlu0 %904, %v1133_v2  }
  0x91   : > { %v293_v5 = vpop.permute.xlu0 %292  ;;  %v285_v9 = vpop.permute.xlu1 %284 }
  0x92   : > { %v295_v6 = vmul.f32 %v906_v4, %v293_v5  ;;  %v290_v10 = vmul.f32 %v906_v4, %v285_v9 }
  0x94   : > { %302 = vrot.lane.b32.xlu1 %v295_v6, %s1007_s9  ;;  %s260_s9 = sand.u32 1, %s978_s19  }
  0x95   : > { %s800_s15 = sshll.u32 %s260_s9, 3  ;;  %s682_s21 = scalar_lea.sflag [#allocation3], %s260_s9 }
  0x9a   : > { %v298_v7 = vpop.permute.xlu0 %297 }
  0x9b   : > { %v300_v8 = vmul.f32 %v906_v4, %v298_v7 }
  0x9d   : > { %306 = vrot.lane.b32.xlu2 %v300_v8, %s1008_s10  ;;  %s814_s10 = sshll.u32 %s692_s8, 3 }
  0xf7   : > { %v307_v11 = vpop.permute.xlu2 %306 }
 0x106   : > { %v303_v12 = vpop.permute.xlu1 %302 }
 0x107   : > { %v310_v13 = vsel %vm309_vm0, %v290_v10, %v303_v12 }
 0x108   : > { %v1141_v14 = vsel %vm311_vm1, %v310_v13, %v307_v11 }
 0x109   : > { %v316_v15 = vand.u32 2139095040, %v1141_v14  ;;  %v313_v18 = vand.u32 2147483647, %v1141_v14  ;;  %vm315_vm14 = vcmp.lt.s32.totalorder %v1141_v14, 0 }
 0x10b   : > { %v317_v16 = vshrl.u32 %v316_v15, 23  ;;  %v320_v20 = vand.u32 8388607, %v313_v18  ;;  %vm314_vm15 = vcmp.le.f32.partialorder %v313_v18, 0.7853982 }
 0x10d   : > { %v805_v17 = vadd.s32 4294967169, %v317_v16  ;;  %v321_v24 = vor.u32 8388608, %v320_v20 }
 0x10f   : > { %v323_v19 = vadd.s32 1, %v805_v17  ;;  %v1158_v47 = vshll.u32 %v321_v24, 8 }
 0x111   : > { %vm324_vm2 = vcmp.gt.s32.totalorder %v323_v19, 0  ;;  %v362_v56 = vand.u32 65535, %v1158_v47  ;;  %v363_v57 = vshrl.u32 %v1158_v47, 16 }
 0x112   : > { %v325_v21 = vsel %vm324_vm2, %v323_v19, 0 }
 0x113   : > { %v327_v22 = vand.u32 31, %v325_v21  ;;  %v1149_v25 = vshrl.u32 %v325_v21, 5 }
 0x115   : > { %v1147_v23 = vsub.s32 32, %v327_v22  ;;  %v330_v27 = vshll.u32 %v1009_v26, %v327_v22  ;;  %v333_v29 = vshll.u32 %v1010_v28, %v327_v22  ;;  %v336_v33 = vshll.u32 %v1011_v31, %v327_v22 }
 0x116   : > { %v339_v36 = vshll.u32 %v1012_v34, %v327_v22  ;;  %v342_v39 = vshll.u32 %v1013_v37, %v327_v22  ;;  %vm345_vm3 = vcmp.lt.s32.totalorder %v1149_v25, 1  ;;  %vm348_vm4 = vcmp.lt.s32.totalorder %v1149_v25, 4 }
 0x117   : > { %v331_v30 = vshrl.u32 %v1010_v28, %v1147_v23  ;;  %v334_v32 = vshrl.u32 %v1011_v31, %v1147_v23  ;;  %v337_v35 = vshrl.u32 %v1012_v34, %v1147_v23  ;;  %v340_v38 = vshrl.u32 %v1013_v37, %v1147_v23 }
 0x118   : > { %v343_v41 = vshrl.u32 %v1014_v40, %v1147_v23  ;;  %vm347_vm5 = vcmp.lt.s32.totalorder %v1149_v25, 3  ;;  %vm346_vm6 = vcmp.lt.s32.totalorder %v1149_v25, 2  ;;  %v329_v22 = vshrl.u32 %v1009_v26, %v1147_v23 }
 0x119   : > { %v332_v42 = vor.u32 %v331_v30, %v330_v27  ;;  %v335_v43 = vor.u32 %v334_v32, %v333_v29  ;;  %v338_v44 = vor.u32 %v337_v35, %v336_v33  ;;  %v341_v45 = vor.u32 %v340_v38, %v339_v36 }
 0x11a   : > { %v344_v46 = vor.u32 %v343_v41, %v342_v39 }
 0x11b   : > { %v353_v48 = vsel %vm345_vm3, %v332_v42, %v335_v43  ;;  %v357_v49 = vsel %vm345_vm3, %v335_v43, %v338_v44  ;;  %v354_v50 = vsel %vm348_vm4, %v341_v45, 920167782  ;;  %v350_v19 = vsel %vm348_vm4, %v338_v44, 2102212464 }
 0x11c   : > { %v358_v51 = vsel %vm348_vm4, %v344_v46, 1326507024  ;;  %v355_v52 = vsel %vm347_vm5, %v338_v44, %v354_v50  ;;  %v349_v31 = vsel %vm345_vm3, %v329_v22, %v332_v42  ;;  %v351_v32 = vsel %vm347_vm5, %v335_v43, %v350_v19 }
 0x11d   : > { %v359_v53 = vsel %vm347_vm5, %v341_v45, %v358_v51  ;;  %v356_v54 = vsel %vm346_vm6, %v353_v48, %v355_v52  ;;  %v352_v23 = vsel %vm346_vm6, %v349_v31, %v351_v32 }
 0x11e   : > { %v360_v55 = vsel %vm346_vm6, %v357_v49, %v359_v53  ;;  %v386_v60 = vand.u32 65535, %v356_v54  ;;  %v387_v61 = vshrl.u32 %v356_v54, 16  ;;  %v406_v39 = vmul.u32 %v1158_v47, %v352_v23 }
 0x11f   : > { %v364_v58 = vand.u32 65535, %v360_v55  ;;  %v365_v59 = vshrl.u32 %v360_v55, 16  ;;  %vm456_vm6 = vweird.f32 %v1141_v14 }
 0x120   : > { %v389_v0 = vmul.u32 %v387_v61, %v362_v56  ;;  %v390_v3 = vmul.u32 %v386_v60, %v363_v57  ;;  %v388_v7 = vmul.u32 %v386_v60, %v362_v56  ;;  %v391_v11 = vmul.u32 %v387_v61, %v363_v57 }
 0x121   : > { %v367_v62 = vmul.u32 %v365_v59, %v362_v56  ;;  %v368_v63 = vmul.u32 %v364_v58, %v363_v57  ;;  %v366_v4 = vmul.u32 %v364_v58, %v362_v56  ;;  %v369_v6 = vmul.u32 %v365_v59, %v363_v57 }
 0x122   : > { %v392_v8 = vshll.u32 %v389_v0, 16  ;;  %v394_v13 = vshll.u32 %v390_v3, 16  ;;  %v393_v29 = vshrl.u32 %v389_v0, 16  ;;  %v395_v35 = vshrl.u32 %v390_v3, 16 }
 0x123   : > { %v370_v5 = vshll.u32 %v367_v62, 16  ;;  %v372_v9 = vshll.u32 %v368_v63, 16  ;;  %v371_v24 = vshrl.u32 %v367_v62, 16  ;;  %v373_v33 = vshrl.u32 %v368_v63, 16 }
 0x124   : > { %vm396_vm8 = vc.u32 %v388_v7, %v392_v8  ;;  %v398_v15 = vadd.s32 %v392_v8, %v388_v7 }
 0x125   : > { %vm374_vm7 = vc.u32 %v366_v4, %v370_v5  ;;  %v376_v10 = vadd.s32 %v370_v5, %v366_v4  ;;  %v397_v17 = vsel %vm396_vm8, 1, %v1005_v1  ;;  %vm660_vm8 = vcmask 1045504  }
 0x126   : > { %v375_v12 = vsel %vm374_vm7, 1, %v1005_v1  ;;  %v399_v21 = vadd.s32 %v397_v17, %v391_v11  ;;  %vm400_vm10 = vc.u32 %v398_v15, %v394_v13  ;;  %v402_v38 = vadd.s32 %v398_v15, %v394_v13 }
 0x127   : > { %v377_v16 = vadd.s32 %v375_v12, %v369_v6  ;;  %vm378_vm9 = vc.u32 %v376_v10, %v372_v9  ;;  %v401_v28 = vsel %vm400_vm10, 1, %v1005_v1  ;;  %vm659_vm7 = vcmask 1044480  }
 0x128   : > { %v379_v20 = vsel %vm378_vm9, 1, %v1005_v1  ;;  %v403_v30 = vadd.s32 %v401_v28, %v399_v21  ;;  %vm635_vm9 = vcmask 23552   ;;  %vm637_vm10 = vcmask 171008  }
 0x129   : > { %v381_v27 = vadd.s32 %v379_v20, %v377_v16 }
 0x12a   : > { %v404_v36 = vadd.s32 %v403_v30, %v393_v29 }
 0x12b   : > { %v382_v34 = vadd.s32 %v381_v27, %v371_v24 }
 0x12c   : > { %v405_v26 = vadd.s32 %v404_v36, %v395_v35 }
 0x12d   : > { %v383_v37 = vadd.s32 %v382_v34, %v373_v33 }
 0x12e   : > { %v409_v1 = vadd.s32 1, %v405_v26 }
 0x12f   : > { %vm408_vm11 = vc.u32 %v383_v37, %v402_v38  ;;  %v407_v25 = vadd.s32 %v402_v38, %v383_v37  ;;  %v622_v37 = vld [vmem:[%s278_s26] sm:$0xff]  ;;  %v646_v38 = vld [vmem:[%s1275_s3 + $0x28] sm:$0x7]  ;;  %s262_s26 = scalar_lea.vmem [#allocation2], %s800_s15  ;;  %s928_s15 = scalar_lea.hbm %s1277_s5, 32 }
 0x130   : > { %v410_v40 = vsel %vm408_vm11, %v409_v1, %v405_v26  ;;  %v1018_v26 = vmov 65535   ;;  %vm639_vm11 = vcmask 318464  }
 0x131   : > { %v411_v41 = vadd.s32 %v410_v40, %v406_v39  ;;  %v661_v1 = vsel %vm659_vm7, 4294967295, %v1018_v26  ;;  %v643_v40 = vld [vmem:[%s1275_s3 + $0x10] sm:$0xff] }
 0x132   : > { %v662_v39 = vsel %vm660_vm8, %v661_v1, 0 }
 0x133   : > { %v412_v42 = vadd.s32 536870912, %v411_v41 }
 0x135   : > { %v413_v44 = vshrl.u32 %v412_v42, 30 }
 0x137   : > { %v414_v45 = vshll.u32 %v413_v44, 30  ;;  %v437_v0 = vsub.s32 4, %v413_v44 }
 0x139   : > { %v415_v43 = vsub.s32 %v411_v41, %v414_v45  ;;  %v438_v7 = vsel %vm315_vm14, %v437_v0, %v413_v44  ;;  %v644_v41 = vld [vmem:[%s1275_s3 + $0x18] sm:$0xff]  ;;  %v641_v45 = vld [vmem:[%s1275_s3] sm:$0xff] }
 0x13a   : > { %v440_v11 = vsel %vm314_vm15, 0, %v438_v7  ;;  %v649_v44 = vpack.c.bf16 %v644_v41, %v643_v40 }
 0x13b   : > { %vm416_vm12 = vcmp.lt.s32.totalorder %v415_v43, 0  ;;  %v417_v46 = vsub.s32 0, %v415_v43  ;;  %v457_v16 = vadd.s32 3, %v440_v11  ;;  %v612_v21 = vand.u32 3, %v440_v11 }
 0x13d   : > { %v418_v48 = vsel %vm416_vm12, %v417_v46, %v415_v43  ;;  %v458_v22 = vand.u32 3, %v457_v16  ;;  %vm613_vm0 = vcmp.lt.s32.totalorder %v612_v21, 2  ;;  %vm614_vm1 = vcmp.eq.s32.totalorder %v612_v21, 0 }
 0x13e   : > { %v419_v49 = vclz %v418_v48  ;;  %vm617_vm2 = vcmp.eq.s32.totalorder %v612_v21, 2  ;;  %vm655_vm12 = vcmask 351232  }
 0x13f   : > { %vm459_vm3 = vcmp.lt.s32.totalorder %v458_v22, 2  ;;  %vm460_vm4 = vcmp.eq.s32.totalorder %v458_v22, 0  ;;  %vm463_vm5 = vcmp.eq.s32.totalorder %v458_v22, 2 }
 0x140   : > { %v806_v50 = vadd.s32 4294967294, %v419_v49 }
 0x142   : > { %vm807_vm13 = vcmp.lt.s32.totalorder %v806_v50, 0 }
 0x143   : > { %v422_v51 = vsel %vm807_vm13, 0, %v806_v50  ;;  %vm679_vm13 = vcmask 261120  }
 0x144   : > { %v423_v52 = vsub.s32 32, %v422_v51  ;;  %v427_v53 = vsub.s32 4294967266, %v422_v51  ;;  %v424_v54 = vshll.u32 %v415_v43, %v422_v51  ;;  %v642_v43 = vld [vmem:[%s1275_s3 + $0x8] sm:$0xff] }
 0x145   : > { %v648_v46 = vpack.c.bf16 %v642_v43, %v641_v45 }
 0x146   : > { %v425_v55 = vshrl.u32 %v407_v25, %v423_v52  ;;  %v428_v56 = vadd.s32 127, %v427_v53 }
 0x148   : > { %v426_v47 = vor.u32 %v425_v55, %v424_v54  ;;  %v429_v57 = vshll.u32 %v428_v56, 23 }
 0x14a   : > { %v430_v58 = vor.u32 4788187, %v429_v57  ;;  %v433_v60 = vcvt.s32.f32 %v426_v47 }
 0x14c   : > { %v431_v59 = vand.u32 2147483647, %v430_v58 }
 0x14e   : > { %v434_v61 = vmul.f32 %v433_v60, %v431_v59 }
 0x150   : > { %v435_v62 = vxor.u32 2147483648, %v434_v61 }
 0x152   : > { %v436_v63 = vsel %vm315_vm14, %v435_v62, %v434_v61 }
 0x153   : > { %v439_v3 = vsel %vm314_vm15, %v1141_v14, %v436_v63  ;;  %v645_v14 = vld [vmem:[%s1275_s3 + $0x20] sm:$0xff] }
 0x154   : > { %v441_v4 = vmul.f32 %v439_v3, %v439_v3  ;;  %v650_v23 = vpack.c.bf16 %v646_v38, %v645_v14 }
 0x156   : > { %v449_v5 = vmul.f32 -0.00019511016, %v441_v4  ;;  %v442_v6 = vmul.f32 -0.001358992, %v441_v4  ;;  %v664_v42 = vand.u32 %v662_v39, %v650_v23 }
 0x158   : > { %v450_v8 = vadd.f32 0.008332121, %v449_v5  ;;  %v443_v9 = vadd.f32 0.041655596, %v442_v6  ;;  %671 = vmatpush.bf16.msra.mxu0 %v664_v42 }
 0x15a   : > { %v451_v10 = vmul.f32 %v450_v8, %v441_v4  ;;  %v444_v12 = vmul.f32 %v443_v9, %v441_v4 }
 0x15c   : > { %v452_v13 = vadd.f32 -0.16666654, %v451_v10  ;;  %v445_v15 = vadd.f32 -0.4999988, %v444_v12  ;;  %672 = vmatpush.bf16.msra.mxu0 %v649_v44 }
 0x15e   : > { %v453_v17 = vmul.f32 %v452_v13, %v441_v4  ;;  %v446_v19 = vmul.f32 %v445_v15, %v441_v4 }
 0x160   : > { %v454_v20 = vadd.f32 1.0, %v453_v17  ;;  %v447_v18 = vadd.f32 1.0, %v446_v19  ;;  %673 = vmatpush.bf16.msra.mxu0 %v648_v46 }
 0x162   : > { %v455_v24 = vmul.f32 %v454_v20, %v439_v3  ;;  %v464_v27 = vxor.u32 2147483648, %v447_v18 }
 0x164   : > { %v461_v28 = vxor.u32 2147483648, %v455_v24  ;;  %v619_v30 = vsel %vm617_vm2, %v464_v27, %v455_v24  ;;  %v465_v32 = vsel %vm463_vm5, %v464_v27, %v455_v24 }
 0x166   : > { %v616_v29 = vsel %vm614_vm1, %v447_v18, %v461_v28  ;;  %v462_v31 = vsel %vm460_vm4, %v447_v18, %v461_v28 }
 0x167   : > { %v620_v33 = vsel %vm613_vm0, %v616_v29, %v619_v30  ;;  %v466_v34 = vsel %vm459_vm3, %v462_v31, %v465_v32 }
 0x168   : > { %v621_v35 = vsel %vm456_vm6, nan, %v620_v33  ;;  %v467_v36 = vsel %vm456_vm6, nan, %v466_v34 }
 0x169   : > { %628 = vrot.lane.b32.xlu1 %v621_v35, %s1015_s12  ;;  %624 = vrot.lane.b32.xlu2 %v467_v36, %s1016_s13  ;;  %s694_s13 = scalar_lea.hbm %s1277_s5, %s814_s10 }
 0x16a   : > { %s698_s0 = sshll.u32 %s694_s13, 4  ;;  %s699_s0 = int_to_ptr.hbm [resolvable:$true] %s698_s0 }
 0x16b   : > { %s922_s22 = sshra.s32 %s699_s0, 4  ;;  %s923_s22 = int_to_ptr.hbm [resolvable:$true] %s922_s22 }
 0x16c   : > { %s924_s30 = scalar_lea.hbm %s923_s22, 8  ;;  %p929_p4 = scmp.lt.s32.totalorder %s923_s22, %s1277_s5 }
 0x16d   : > { %p925_p0 = scmp.ne.s32.totalorder %s923_s22, %s924_s30  ;;  %p930_p5 = scmp.lt.s32.totalorder %s928_s15, %s924_s30 }
 0x16f   : > { %p926_p1 = pnand %p925_p0, %p1100_p3  ;;  %p931_p6 = por %p930_p5, %p929_p4 }
 0x171   : > { %632 = vrot.lane.b32.xlu2 %v622_v37, %s1017_s27  ;;  %s696_s27 = sshll.u32 %s262_s26, 4  ;;  %p927_p2 = pneg %p926_p1  ;;  %s697_s27 = int_to_ptr.vmem [resolvable:$true] %s696_s27 }
 0x173   : > { %p932_p7 = pnand %p931_p6, %p927_p2 }
 0x1c3   : > { %v625_v48 = vpop.permute.xlu2 %624 }
 0x1c4   : > { %v636_v50 = vsel %vm635_vm9, %v1133_v2, %v625_v48  ;;  %v907_v2 = vld [vmem:[%s1276_s4] ss:$0 sm:$0xff] }
 0x1cb   : > { %v633_v49 = vpop.permute.xlu2 %632 }
 0x1db   : > { %v629_v51 = vpop.permute.xlu1 %628 }
 0x1dc   : > { %v638_v25 = vsel %vm637_vm10, %v636_v50, %v629_v51 }
 0x1dd   : > { %v640_v52 = vsel %vm639_vm11, %v638_v25, %v633_v49 }
 0x1de   : > { %v647_v53 = vpack.c.bf16 %v640_v52, %v640_v52 }
 0x1e0   : > { %811 = vmatmul.msk.bf16.vlgmr.msra.gmra.mxu0 %vm655_vm12, %v647_v53 }
 0x25d   : > { %v675_v54 = vpop.f32.mrf.mxu0 }
 0x25e   : > { %v676_v55 = vadd.f32 %v907_v2, %v675_v54 }
 0x260   : > { %680 = vst.msk [vmem:[%s262_s26] sm:$0xff] %vm679_vm13, %v676_v55 }
 0x261   : > { %935 = shalt.err (!%p932_p7)
}
 0x262   : > { %817 = dma.vmem_to_hbm [thread:$0]  (%p1100_p3), %s697_s27, 128, %s699_s0, %s682_s21  }
 0x265   : > { %v677_v56 = vpop.f32.mrf.mxu0 }
 0x266 PF: > { %p823_p9 = scmp.ge.s32.totalorder %s1002_s25, 2  ;;  %s710_s9 = sand.u32 1, %s974_s18  }
 0x267   : > { %s711_s13 = scalar_lea.sflag [#allocation3], %s710_s9 }
 0x268   : > { %p820_p10 = pnand %p823_p9, %p1109_p8 }
 0x26a   : > { %p821_p11 = pneg %p820_p10 }
 0x26c   : > { %969 = dma.done.wait (%p821_p11), %s711_s13, 128  }
 0x26d   : > { %971 = vsyncadd (%p821_p11), %s711_s13, 4294967168  ;;  %s18_s25 = sadd.s32 1, %s1002_s25   ;;  %s1282_s18 = smov %s978_s19 }
 0x26e   : > { %p15_p12 = scmp.ge.s32.totalorder %s18_s25, 6   ;;  %s1283_s19 = smov %s982_s20 }
 0x26f   : > { %s1284_s20 = smov %s1118_s11  ;;  %s1285_s21 = smov %s994_s23 }
 0x270   : > { %s1286_s22 = smov %s998_s24  ;;  %s1287_s23 = smov %s1290_s28 }
 0x271   : > { %s1288_s24 = smov %s1294_s29  ;;  %17 = sbr.rel (!%p15_p12) target bundleno = 7 (0x7), region = 78 }
 0x276   :  { %717 = vsyncpa [#allocation3], 1 }
 0x277   :  { %719 = vsyncpa [#allocation3 + $0x1], 1 }

</bundles_post_ra>
